<compile_context>
chip_gen: v5e
topology: v5e:2x2
jax: 0.10.0
libtpu: 0.0.40
codegen_flags: <defaults>
</compile_context>

<pallas_src>
import functools
import math

import jax
import jax.numpy as jnp
import numpy as np
from jax.experimental import pallas as pl
from jax.experimental.pallas import tpu as pltpu

LN_EPS = 1e-5


# ----------------------------------------------------------------------------
# Generation-aware knobs.
# ----------------------------------------------------------------------------
@functools.lru_cache(maxsize=None)
def _vmem_limit_bytes():
    """~75% of physical VMEM (v7x: 64 MiB), capped at 100 MiB on 128-MiB parts."""
    cap = 64 * 1024 * 1024
    try:
        cap = int(pltpu.get_tpu_info().vmem_capacity_bytes)
    except Exception:
        pass
    return min((cap * 3) // 4, 100 * 1024 * 1024)


@functools.lru_cache(maxsize=None)
def _has_bf16_vector_units():
    """v6e/v7x VPU+EUP have a bf16 path; v5e and older do not."""
    try:
        kind = jax.devices()[0].device_kind.lower()
    except Exception:
        return False
    return not any(t in kind for t in ("v2", "v3", "v4", "v5"))


def _seq_tile(S, max_rows=512):
    """Full-extent block if it fits (always layout-legal); otherwise a 128-multiple tile
    with a cdiv grid handling the (row-independent) ragged last tile."""
    return S if S <= max_rows else max_rows


# ----------------------------------------------------------------------------
# Kernel 1: fused LayerNorm + Linear projection (in_proj), seq-tiled.
#   block: x [tS, E], gamma/beta/bias [1, E] f32, Wt [E, E] bf16 -> out [tS, E] bf16
# ----------------------------------------------------------------------------
def ln_proj_kernel(x_ref, gamma_ref, beta_ref, wt_ref, bias_ref, o_ref):
    x = x_ref[...].astype(jnp.float32)                        # [tS, E]
    mean = jnp.mean(x, axis=-1, keepdims=True)
    xc = x - mean
    var = jnp.mean(xc * xc, axis=-1, keepdims=True)           # biased, like torch LN
    xn = xc * jax.lax.rsqrt(var + LN_EPS)
    xn = xn * gamma_ref[...] + beta_ref[...]                   # f32, broadcast [1, E]
    # bf16 operands on the MXU, f32 accumulation.
    y = jax.lax.dot_general(
        xn.astype(jnp.bfloat16), wt_ref[...],
        (((1,), (0,)), ((), ())),
        preferred_element_type=jnp.float32,
    )
    o_ref[...] = (y + bias_ref[...]).astype(o_ref.dtype)       # bf16 out


_WEIGHT_SINGLE_BUFFER_OK = True   # cached capability flag for pl.Buffered(1)


def _ln_proj_call(x, gamma2, beta2, wt, b2, tS, single_buffer_w):
    B, S, E = x.shape
    row_spec = pl.BlockSpec((1, E), lambda bi, ti: (0, 0))     # constant -> DMA'd once
    seq_spec = pl.BlockSpec((pl.Squeezed(), tS, E), lambda bi, ti: (bi, ti, 0))
    if single_buffer_w:
        # Constant index_map: the weight block never changes, so 1 buffer instead of the
        # default 2 halves its resident VMEM footprint (critical on v7x's 64 MiB).
        w_spec = pl.BlockSpec((E, E), lambda bi, ti: (0, 0),
                              pipeline_mode=pl.Buffered(1))
    else:
        w_spec = pl.BlockSpec((E, E), lambda bi, ti: (0, 0))
    return pl.pallas_call(
        ln_proj_kernel,
        out_shape=jax.ShapeDtypeStruct((B, S, E), jnp.bfloat16),
        grid=(B, pl.cdiv(S, tS)),
        in_specs=[seq_spec, row_spec, row_spec, w_spec, row_spec],
        out_specs=seq_spec,
        compiler_params=pltpu.CompilerParams(
            dimension_semantics=("parallel", "parallel"),
            vmem_limit_bytes=_vmem_limit_bytes(),
        ),
    )(x, gamma2, beta2, wt, b2)


def ln_proj(x, gamma2, beta2, wt, b2, *, max_rows=512):
    """bf16( LayerNorm(x) @ W.T + b ) for x: [B, S, E]; expects prepared params."""
    global _WEIGHT_SINGLE_BUFFER_OK
    tS = _seq_tile(x.shape[1], max_rows)
    if _WEIGHT_SINGLE_BUFFER_OK:
        try:
            return _ln_proj_call(x, gamma2, beta2, wt, b2, tS, True)
        except Exception:
            # This JAX build rejects single-buffer pipeline_mode; fall back to default.
            _WEIGHT_SINGLE_BUFFER_OK = False
    return _ln_proj_call(x, gamma2, beta2, wt, b2, tS, False)


# ----------------------------------------------------------------------------
# Kernel 2: scaled dot-product attention, all heads of one (batch, Sq-tile) per step.
#   q [tq, E] bf16, kv [Skv, E] bf16 -> out [tq, E] bf16
# ----------------------------------------------------------------------------
def _make_attn_kernel(H, Dh, *, scale, bf16_vector_ok):
    # Group heads so each o_ref store spans (up to) 128 lane-aligned output lanes, while
    # keeping at most ~128 lanes of f32 accumulators live at a time.  This replaces the
    # old "append all heads + concatenate" epilogue that spilled vregs for H > a few.
    if Dh % 128 == 0 or 128 % Dh != 0:
        hpg = 1
    else:
        hpg = min(H, 128 // Dh)
        while H % hpg:
            hpg -= 1
    exp_dtype = jnp.bfloat16 if bf16_vector_ok else jnp.float32

    def attn_kernel(q_ref, kv_ref, o_ref):
        # Fold 1/sqrt(Dh) into q once: Sq*E multiplies vs Sq*Skv per head.
        if bf16_vector_ok:
            q = (q_ref[...] * jnp.bfloat16(scale)).astype(jnp.bfloat16)   # no cast pass
        else:
            q = (q_ref[...].astype(jnp.float32) * scale).astype(jnp.bfloat16)
        kv = kv_ref[...].astype(jnp.bfloat16)                  # [Skv, E] (K and V)
        for g in range(H // hpg):
            outs = []
            for h in range(g * hpg, (g + 1) * hpg):            # static unroll over heads
                lo = h * Dh
                qh = q[:, lo:lo + Dh]                           # [tq, Dh]
                kvh = kv[:, lo:lo + Dh]                         # [Skv, Dh]
                # Contract last dims directly -- no k.T materialization.
                s = jax.lax.dot_general(
                    qh, kvh, (((1,), (1,)), ((), ())),
                    preferred_element_type=jnp.float32)         # [tq, Skv] f32
                m = jnp.max(s, axis=-1, keepdims=True)
                # bf16 exp on v6e/v7x (EUP-bound for small Dh); f32 exp on v5e.
                p = jnp.exp((s - m).astype(exp_dtype))
                l = jnp.sum(p.astype(jnp.float32), axis=-1, keepdims=True)
                acc = jax.lax.dot_general(
                    p.astype(jnp.bfloat16), kvh, (((1,), (0,)), ((), ())),
                    preferred_element_type=jnp.float32)         # [tq, Dh] f32
                # Deferred normalization on the small output; reciprocal -> EUP slot.
                outs.append(acc * pl.reciprocal(l, approx=True))
            blk = outs[0] if hpg == 1 else jnp.concatenate(outs, axis=-1)
            # Direct per-group store bounds live ranges (no whole-E concat epilogue).
            o_ref[:, g * hpg * Dh:(g + 1) * hpg * Dh] = blk.astype(o_ref.dtype)

    return attn_kernel


def attention(q, kv, head_size, *, max_q_rows=512):
    """q: [B, Sq, E], kv: [B, Skv, E] (bf16) -> [B, Sq, E] bf16; heads sliced in-kernel."""
    q = q.astype(jnp.bfloat16)
    kv = kv.astype(jnp.bfloat16)
    B, Sq, E = q.shape
    Skv = kv.shape[1]
    H = E // head_size
    tq = _seq_tile(Sq, max_q_rows)
    kern = _make_attn_kernel(H, head_size,
                             scale=1.0 / math.sqrt(head_size),
                             bf16_vector_ok=_has_bf16_vector_units())
    # TODO(synk): for long Skv, add a trailing 'arbitrary' KV grid axis with an
    # online-softmax VMEM accumulator (flash form) instead of the full [tq, Skv] tile.
    return pl.pallas_call(
        kern,
        out_shape=jax.ShapeDtypeStruct((B, Sq, E), jnp.bfloat16),   # bf16 writeback
        grid=(B, pl.cdiv(Sq, tq)),
        in_specs=[
            pl.BlockSpec((pl.Squeezed(), tq, E), lambda b, qi: (b, qi, 0)),
            pl.BlockSpec((pl.Squeezed(), Skv, E), lambda b, qi: (b, 0, 0)),  # kv resident per batch
        ],
        out_specs=pl.BlockSpec((pl.Squeezed(), tq, E), lambda b, qi: (b, qi, 0)),
        compiler_params=pltpu.CompilerParams(
            dimension_semantics=("parallel", "parallel"),
            vmem_limit_bytes=_vmem_limit_bytes(),
        ),
    )(q, kv)


# ----------------------------------------------------------------------------
# Parameter preparation (hoisted out of the forward hot path) + module forward.
# ----------------------------------------------------------------------------
def prepare_params(params):
    """One-time layout/cast of parameters: W.T in bf16, [1,E] f32 gamma/beta/bias."""
    E = params["w"].shape[0]
    return {
        "wt": jnp.asarray(params["w"], jnp.float32).T.astype(jnp.bfloat16),  # [E_in, E_out]
        "b": jnp.asarray(params["b"], jnp.float32).reshape(1, E),
        "ln_gamma": jnp.asarray(params["ln_gamma"], jnp.float32).reshape(1, E),
        "ln_beta": jnp.asarray(params["ln_beta"], jnp.float32).reshape(1, E),
    }


def multihead_cross_attention(x, y, prepared, head_size):
    q = ln_proj(x, prepared["ln_gamma"], prepared["ln_beta"], prepared["wt"], prepared["b"])
    kv = ln_proj(y, prepared["ln_gamma"], prepared["ln_beta"], prepared["wt"], prepared["b"])
    # TODO(synk): optionally fuse the kv-side ln_proj into the attention kernel to save
    # one kv HBM round trip (largest relative win on v5e's lower HBM bandwidth).
    return attention(q, kv, head_size)                        # [B, Sq, E] bf16


# ----------------------------------------------------------------------------
# Pure-JAX f32 reference for a correctness sanity check.
# ----------------------------------------------------------------------------
def reference_forward(x, y, params, head_size):
    def ln(t):
        mean = jnp.mean(t, axis=-1, keepdims=True)
        var = jnp.mean((t - mean) ** 2, axis=-1, keepdims=True)
        return (t - mean) / jnp.sqrt(var + LN_EPS) * params["ln_gamma"] + params["ln_beta"]

    B, Sq, E = x.shape
    Skv = y.shape[1]
    H = E // head_size
    q = ln(x) @ params["w"].T + params["b"]
    kv = ln(y) @ params["w"].T + params["b"]
    qh = q.reshape(B, Sq, H, head_size).transpose(0, 2, 1, 3)
    kvh = kv.reshape(B, Skv, H, head_size).transpose(0, 2, 1, 3)
    s = jnp.einsum("bhqd,bhkd->bhqk", qh, kvh) / math.sqrt(head_size)
    p = jax.nn.softmax(s, axis=-1)
    a = jnp.einsum("bhqk,bhkd->bhqd", p, kvh)
    return a.transpose(0, 2, 1, 3).reshape(B, Sq, E)


if __name__ == "__main__":
    # Small shapes consistent with the module.
    B, Sq, Skv = 2, 16, 8
    embed_dim, head_size = 32, 8          # -> H = 4 heads, Dh = 8

    key = jax.random.PRNGKey(0)
    kx, ky, kg, kb, kw, kbi = jax.random.split(key, 6)

    x = jax.random.normal(kx, (B, Sq, embed_dim), dtype=jnp.float32)
    y = jax.random.normal(ky, (B, Skv, embed_dim), dtype=jnp.float32)

    # Deterministic synthetic parameters (shapes from nn.LayerNorm / nn.Linear).
    params = {
        "ln_gamma": 1.0 + 0.1 * jax.random.normal(kg, (embed_dim,), dtype=jnp.float32),
        "ln_beta": 0.1 * jax.random.normal(kb, (embed_dim,), dtype=jnp.float32),
        "w": jax.random.normal(kw, (embed_dim, embed_dim), dtype=jnp.float32)
        / math.sqrt(embed_dim),
        "b": 0.1 * jax.random.normal(kbi, (embed_dim,), dtype=jnp.float32),
    }

    prepared = prepare_params(params)     # hoisted: computed once per parameter set
    out = multihead_cross_attention(x, y, prepared, head_size)
    out = jax.block_until_ready(out)

    ref = reference_forward(x, y, params, head_size)
    # bf16 MXU operands + bf16 output + (possibly) bf16 exp + approx reciprocal -> compare
    # against the f32 reference with a correspondingly relaxed tolerance.
    out_f32 = np.asarray(jnp.asarray(out, jnp.float32))
    np.testing.assert_allclose(out_f32, np.asarray(ref), atol=5e-2, rtol=5e-2)
    assert not np.any(np.isnan(out_f32))

    print("KERNEL_OK")
</pallas_src>

<mosaic_0001>
module attributes {stable_mosaic.version = 11 : i64} {
  func.func @ln_proj_kernel(%arg0: i32, %arg1: i32, %arg2: memref<1x16x32xf32, #tpu.memory_space<vmem>>, %arg3: memref<1x32xf32, #tpu.memory_space<vmem>>, %arg4: memref<1x32xf32, #tpu.memory_space<vmem>>, %arg5: memref<32x32xbf16, #tpu.memory_space<vmem>>, %arg6: memref<1x32xf32, #tpu.memory_space<vmem>>, %arg7: memref<1x16x32xbf16, #tpu.memory_space<vmem>>) attributes {dimension_semantics = [#tpu.dimension_semantics<parallel>, #tpu.dimension_semantics<parallel>], iteration_bounds = array<i64: 2, 1>, scalar_prefetch = 0 : i64, scratch_operands = 0 : i64, tpu.core_type = #tpu.core_type<tc>, window_params = [{transform_indices = @transform_0, window_bounds = array<i64: 1, 16, 32>}, {pipeline_mode = #tpu.pipeline_mode<synchronous>, transform_indices = @transform_1, window_bounds = array<i64: 1, 32>}, {pipeline_mode = #tpu.pipeline_mode<synchronous>, transform_indices = @transform_2, window_bounds = array<i64: 1, 32>}, {pipeline_mode = #tpu.pipeline_mode<synchronous>, transform_indices = @transform_3, window_bounds = array<i64: 32, 32>}, {pipeline_mode = #tpu.pipeline_mode<synchronous>, transform_indices = @transform_4, window_bounds = array<i64: 1, 32>}, {transform_indices = @transform_5, window_bounds = array<i64: 1, 16, 32>}]} {
    %c0 = arith.constant 0 : index
    %c0_0 = arith.constant 0 : index
    %c0_1 = arith.constant 0 : index
    %0 = vector.load %arg2[%c0, %c0_0, %c0_1] : memref<1x16x32xf32, #tpu.memory_space<vmem>>, vector<1x16x32xf32>
    %1 = vector.shape_cast %0 : vector<1x16x32xf32> to vector<16x32xf32>
    %cst = arith.constant dense<0.000000e+00> : vector<16xf32>
    %2 = vector.multi_reduction <add>, %1, %cst [1] : vector<16x32xf32> to vector<16xf32>
    %3 = vector.shape_cast %2 : vector<16xf32> to vector<16x1xf32>
    %cst_2 = arith.constant 3.200000e+01 : f32
    %4 = vector.broadcast %cst_2 : f32 to vector<16x1xf32>
    %5 = arith.divf %3, %4 : vector<16x1xf32>
    %6 = vector.broadcast %5 : vector<16x1xf32> to vector<16x32xf32>
    %7 = arith.subf %1, %6 : vector<16x32xf32>
    %8 = arith.mulf %7, %7 : vector<16x32xf32>
    %cst_3 = arith.constant dense<0.000000e+00> : vector<16xf32>
    %9 = vector.multi_reduction <add>, %8, %cst_3 [1] : vector<16x32xf32> to vector<16xf32>
    %10 = vector.shape_cast %9 : vector<16xf32> to vector<16x1xf32>
    %cst_4 = arith.constant 3.200000e+01 : f32
    %11 = vector.broadcast %cst_4 : f32 to vector<16x1xf32>
    %12 = arith.divf %10, %11 : vector<16x1xf32>
    %cst_5 = arith.constant 9.99999974E-6 : f32
    %13 = vector.broadcast %cst_5 : f32 to vector<16x1xf32>
    %14 = arith.addf %12, %13 : vector<16x1xf32>
    %15 = math.rsqrt %14 : vector<16x1xf32>
    %16 = vector.broadcast %15 : vector<16x1xf32> to vector<16x32xf32>
    %17 = arith.mulf %7, %16 : vector<16x32xf32>
    %c0_6 = arith.constant 0 : index
    %c0_7 = arith.constant 0 : index
    %18 = vector.load %arg3[%c0_6, %c0_7] : memref<1x32xf32, #tpu.memory_space<vmem>>, vector<1x32xf32>
    %19 = vector.broadcast %18 : vector<1x32xf32> to vector<16x32xf32>
    %20 = arith.mulf %17, %19 : vector<16x32xf32>
    %c0_8 = arith.constant 0 : index
    %c0_9 = arith.constant 0 : index
    %21 = vector.load %arg4[%c0_8, %c0_9] : memref<1x32xf32, #tpu.memory_space<vmem>>, vector<1x32xf32>
    %22 = vector.broadcast %21 : vector<1x32xf32> to vector<16x32xf32>
    %23 = arith.addf %20, %22 : vector<16x32xf32>
    %24 = arith.truncf %23 : vector<16x32xf32> to vector<16x32xbf16>
    %c0_10 = arith.constant 0 : index
    %c0_11 = arith.constant 0 : index
    %25 = vector.load %arg5[%c0_10, %c0_11] : memref<32x32xbf16, #tpu.memory_space<vmem>>, vector<32x32xbf16>
    %cst_12 = arith.constant dense<0.000000e+00> : vector<16x32xf32>
    %26 = tpu.matmul %24, %25, %cst_12 {dimension_numbers = #tpu.dot_dimension_numbers<[1], [0], [0], [1], [0, 0, 1, 1], [], []>} : vector<16x32xbf16>, vector<32x32xbf16>, vector<16x32xf32> -> vector<16x32xf32>
    %c0_13 = arith.constant 0 : index
    %c0_14 = arith.constant 0 : index
    %27 = vector.load %arg6[%c0_13, %c0_14] : memref<1x32xf32, #tpu.memory_space<vmem>>, vector<1x32xf32>
    %28 = vector.broadcast %27 : vector<1x32xf32> to vector<16x32xf32>
    %29 = arith.addf %26, %28 : vector<16x32xf32>
    %30 = arith.truncf %29 : vector<16x32xf32> to vector<16x32xbf16>
    %c0_15 = arith.constant 0 : index
    %c0_16 = arith.constant 0 : index
    %c0_17 = arith.constant 0 : index
    %31 = vector.load %arg7[%c0_15, %c0_16, %c0_17] : memref<1x16x32xbf16, #tpu.memory_space<vmem>>, vector<1x16x32xbf16>
    %32 = vector.shape_cast %31 : vector<1x16x32xbf16> to vector<16x32xbf16>
    %33 = vector.shape_cast %30 : vector<16x32xbf16> to vector<1x16x32xbf16>
    tpu.vector_store %arg7[%c0_15, %c0_16, %c0_17], %33 {strides = array<i32>} : memref<1x16x32xbf16, #tpu.memory_space<vmem>>, vector<1x16x32xbf16>,
    return
  }
  func.func @transform_0(%arg0: i32, %arg1: i32) -> (i32, i32, i32) {
    %c0_i32 = arith.constant 0 : i32
    %c0_i32_0 = arith.constant 0 : i32
    return %arg0, %arg1, %c0_i32 : i32, i32, i32
  }
  func.func @transform_1(%arg0: i32, %arg1: i32) -> (i32, i32) {
    %c0_i32 = arith.constant 0 : i32
    %c0_i32_0 = arith.constant 0 : i32
    %c0_i32_1 = arith.constant 0 : i32
    return %c0_i32, %c0_i32_0 : i32, i32
  }
  func.func @transform_2(%arg0: i32, %arg1: i32) -> (i32, i32) {
    %c0_i32 = arith.constant 0 : i32
    %c0_i32_0 = arith.constant 0 : i32
    %c0_i32_1 = arith.constant 0 : i32
    return %c0_i32, %c0_i32_0 : i32, i32
  }
  func.func @transform_3(%arg0: i32, %arg1: i32) -> (i32, i32) {
    %c0_i32 = arith.constant 0 : i32
    %c0_i32_0 = arith.constant 0 : i32
    %c0_i32_1 = arith.constant 0 : i32
    return %c0_i32, %c0_i32_0 : i32, i32
  }
  func.func @transform_4(%arg0: i32, %arg1: i32) -> (i32, i32) {
    %c0_i32 = arith.constant 0 : i32
    %c0_i32_0 = arith.constant 0 : i32
    %c0_i32_1 = arith.constant 0 : i32
    return %c0_i32, %c0_i32_0 : i32, i32
  }
  func.func @transform_5(%arg0: i32, %arg1: i32) -> (i32, i32, i32) {
    %c0_i32 = arith.constant 0 : i32
    %c0_i32_0 = arith.constant 0 : i32
    return %arg0, %arg1, %c0_i32 : i32, i32, i32
  }
}

module attributes {stable_mosaic.version = 11 : i64} {
  func.func @ln_proj_kernel(%arg0: i32, %arg1: i32, %arg2: memref<1x16x32xf32, #tpu.memory_space<vmem>>, %arg3: memref<1x32xf32, #tpu.memory_space<vmem>>, %arg4: memref<1x32xf32, #tpu.memory_space<vmem>>, %arg5: memref<32x32xbf16, #tpu.memory_space<vmem>>, %arg6: memref<1x32xf32, #tpu.memory_space<vmem>>, %arg7: memref<1x16x32xbf16, #tpu.memory_space<vmem>>) attributes {dimension_semantics = [#tpu.dimension_semantics<parallel>, #tpu.dimension_semantics<parallel>], iteration_bounds = array<i64: 2, 1>, scalar_prefetch = 0 : i64, scratch_operands = 0 : i64, tpu.core_type = #tpu.core_type<tc>, window_params = [{transform_indices = @transform_0, window_bounds = array<i64: 1, 16, 32>}, {pipeline_mode = #tpu.pipeline_mode<synchronous>, transform_indices = @transform_1, window_bounds = array<i64: 1, 32>}, {pipeline_mode = #tpu.pipeline_mode<synchronous>, transform_indices = @transform_2, window_bounds = array<i64: 1, 32>}, {pipeline_mode = #tpu.pipeline_mode<synchronous>, transform_indices = @transform_3, window_bounds = array<i64: 32, 32>}, {pipeline_mode = #tpu.pipeline_mode<synchronous>, transform_indices = @transform_4, window_bounds = array<i64: 1, 32>}, {transform_indices = @transform_5, window_bounds = array<i64: 1, 16, 32>}]} {
    %c0 = arith.constant 0 : index
    %c0_0 = arith.constant 0 : index
    %c0_1 = arith.constant 0 : index
    %0 = vector.load %arg2[%c0, %c0_0, %c0_1] : memref<1x16x32xf32, #tpu.memory_space<vmem>>, vector<1x16x32xf32>
    %1 = vector.shape_cast %0 : vector<1x16x32xf32> to vector<16x32xf32>
    %cst = arith.constant dense<0.000000e+00> : vector<16xf32>
    %2 = vector.multi_reduction <add>, %1, %cst [1] : vector<16x32xf32> to vector<16xf32>
    %3 = vector.shape_cast %2 : vector<16xf32> to vector<16x1xf32>
    %cst_2 = arith.constant 3.200000e+01 : f32
    %4 = vector.broadcast %cst_2 : f32 to vector<16x1xf32>
    %5 = arith.divf %3, %4 : vector<16x1xf32>
    %6 = vector.broadcast %5 : vector<16x1xf32> to vector<16x32xf32>
    %7 = arith.subf %1, %6 : vector<16x32xf32>
    %8 = arith.mulf %7, %7 : vector<16x32xf32>
    %cst_3 = arith.constant dense<0.000000e+00> : vector<16xf32>
    %9 = vector.multi_reduction <add>, %8, %cst_3 [1] : vector<16x32xf32> to vector<16xf32>
    %10 = vector.shape_cast %9 : vector<16xf32> to vector<16x1xf32>
    %cst_4 = arith.constant 3.200000e+01 : f32
    %11 = vector.broadcast %cst_4 : f32 to vector<16x1xf32>
    %12 = arith.divf %10, %11 : vector<16x1xf32>
    %cst_5 = arith.constant 9.99999974E-6 : f32
    %13 = vector.broadcast %cst_5 : f32 to vector<16x1xf32>
    %14 = arith.addf %12, %13 : vector<16x1xf32>
    %15 = math.rsqrt %14 : vector<16x1xf32>
    %16 = vector.broadcast %15 : vector<16x1xf32> to vector<16x32xf32>
    %17 = arith.mulf %7, %16 : vector<16x32xf32>
    %c0_6 = arith.constant 0 : index
    %c0_7 = arith.constant 0 : index
    %18 = vector.load %arg3[%c0_6, %c0_7] : memref<1x32xf32, #tpu.memory_space<vmem>>, vector<1x32xf32>
    %19 = vector.broadcast %18 : vector<1x32xf32> to vector<16x32xf32>
    %20 = arith.mulf %17, %19 : vector<16x32xf32>
    %c0_8 = arith.constant 0 : index
    %c0_9 = arith.constant 0 : index
    %21 = vector.load %arg4[%c0_8, %c0_9] : memref<1x32xf32, #tpu.memory_space<vmem>>, vector<1x32xf32>
    %22 = vector.broadcast %21 : vector<1x32xf32> to vector<16x32xf32>
    %23 = arith.addf %20, %22 : vector<16x32xf32>
    %24 = arith.truncf %23 : vector<16x32xf32> to vector<16x32xbf16>
    %c0_10 = arith.constant 0 : index
    %c0_11 = arith.constant 0 : index
    %25 = vector.load %arg5[%c0_10, %c0_11] : memref<32x32xbf16, #tpu.memory_space<vmem>>, vector<32x32xbf16>
    %cst_12 = arith.constant dense<0.000000e+00> : vector<16x32xf32>
    %26 = tpu.matmul %24, %25, %cst_12 {dimension_numbers = #tpu.dot_dimension_numbers<[1], [0], [0], [1], [0, 0, 1, 1], [], []>} : vector<16x32xbf16>, vector<32x32xbf16>, vector<16x32xf32> -> vector<16x32xf32>
    %c0_13 = arith.constant 0 : index
    %c0_14 = arith.constant 0 : index
    %27 = vector.load %arg6[%c0_13, %c0_14] : memref<1x32xf32, #tpu.memory_space<vmem>>, vector<1x32xf32>
    %28 = vector.broadcast %27 : vector<1x32xf32> to vector<16x32xf32>
    %29 = arith.addf %26, %28 : vector<16x32xf32>
    %30 = arith.truncf %29 : vector<16x32xf32> to vector<16x32xbf16>
    %c0_15 = arith.constant 0 : index
    %c0_16 = arith.constant 0 : index
    %c0_17 = arith.constant 0 : index
    %31 = vector.load %arg7[%c0_15, %c0_16, %c0_17] : memref<1x16x32xbf16, #tpu.memory_space<vmem>>, vector<1x16x32xbf16>
    %32 = vector.shape_cast %31 : vector<1x16x32xbf16> to vector<16x32xbf16>
    %33 = vector.shape_cast %30 : vector<16x32xbf16> to vector<1x16x32xbf16>
    tpu.vector_store %arg7[%c0_15, %c0_16, %c0_17], %33 {strides = array<i32>} : memref<1x16x32xbf16, #tpu.memory_space<vmem>>, vector<1x16x32xbf16>,
    return
  }
  func.func @transform_0(%arg0: i32, %arg1: i32) -> (i32, i32, i32) {
    %c0_i32 = arith.constant 0 : i32
    %c0_i32_0 = arith.constant 0 : i32
    return %arg0, %arg1, %c0_i32 : i32, i32, i32
  }
  func.func @transform_1(%arg0: i32, %arg1: i32) -> (i32, i32) {
    %c0_i32 = arith.constant 0 : i32
    %c0_i32_0 = arith.constant 0 : i32
    %c0_i32_1 = arith.constant 0 : i32
    return %c0_i32, %c0_i32_0 : i32, i32
  }
  func.func @transform_2(%arg0: i32, %arg1: i32) -> (i32, i32) {
    %c0_i32 = arith.constant 0 : i32
    %c0_i32_0 = arith.constant 0 : i32
    %c0_i32_1 = arith.constant 0 : i32
    return %c0_i32, %c0_i32_0 : i32, i32
  }
  func.func @transform_3(%arg0: i32, %arg1: i32) -> (i32, i32) {
    %c0_i32 = arith.constant 0 : i32
    %c0_i32_0 = arith.constant 0 : i32
    %c0_i32_1 = arith.constant 0 : i32
    return %c0_i32, %c0_i32_0 : i32, i32
  }
  func.func @transform_4(%arg0: i32, %arg1: i32) -> (i32, i32) {
    %c0_i32 = arith.constant 0 : i32
    %c0_i32_0 = arith.constant 0 : i32
    %c0_i32_1 = arith.constant 0 : i32
    return %c0_i32, %c0_i32_0 : i32, i32
  }
  func.func @transform_5(%arg0: i32, %arg1: i32) -> (i32, i32, i32) {
    %c0_i32 = arith.constant 0 : i32
    %c0_i32_0 = arith.constant 0 : i32
    return %arg0, %arg1, %c0_i32 : i32, i32, i32
  }
}

</mosaic_0001>

<bundles_post_ra>
// kernel: tpu_custom_call.1
= control target key start
LH: loop header
LB: loop body
LE: loop exit
PB: predicated region body
PF: predicated region fallthrough
CT: control target
= control target key end

     0   :  { %s1044_s0 = inlined_call_operand.hbm [shape: f32[2,16,32], index: 0, kind: input, shape index: {}]   ;;  %s1045_s1 = inlined_call_operand.hbm [shape: f32[1,32], index: 1, kind: input, shape index: {}]   ;;  %s1046_s2 = inlined_call_operand.vmem [shape: f32[1,32], index: 2, kind: input, shape index: {}]   ;;  %s1047_s3 = inlined_call_operand.hbm [shape: bf16[32,32], index: 3, kind: input, shape index: {}]   ;;  %s1048_s4 = inlined_call_operand.vmem [shape: f32[1,32], index: 4, kind: input, shape index: {}]   ;;  %s1049_s5 = inlined_call_operand.hbm [shape: bf16[2,16,32], index: 5, kind: output, shape index: {}]  }
   0x1   :  { %1052 = sst [smem:[#allocation13_spill]] %s1045_s1 }
   0x2   :  { %1053 = sst [smem:[#allocation14_spill]] %s1047_s3 }
   0x3   :  { %10 = vsyncpa [#allocation3], 0 }
   0x4   :  { %12 = vsyncpa [#allocation3 + $0x1], 0 }
   0x5   :  { %13 = vsyncpa [#allocation6], 0 }
   0x6   :  { %14 = vsyncpa [#allocation4], 0 }
   0x7   :  { %16 = vsyncpa [#allocation4 + $0x1], 0  ;;  %s878_s18 = smov 0   ;;  %s880_s19 = smov 0  }
   0x8   :  { %s882_s20 = smov 0   ;;  %s884_s21 = smov 0  }
   0x9   :  { %s886_s22 = smov 0   ;;  %s888_s23 = smov 0  }
   0xa LB: > { %1054 = sst [smem:[#allocation12_spill]] %s837_s23  ;;  %s530_s24 = sadd.s32 4294967295, %s837_s23   ;;  %s837_s23 = sphi %s888_s23, %s22_s23   ;;  %s833_s22 = sphi %s886_s22, %s1070_s22   ;;  %s829_s21 = sphi %s884_s21, %s1069_s21   ;;  %s825_s20 = sphi %s882_s20, %s1068_s20   ;;  %s821_s19 = sphi %s880_s19, %s1067_s19   ;;  %s817_s18 = sphi %s878_s18, %s1066_s18  }
   0xb   : > { %s531_s25 = sadd.s32 4294967294, %s837_s23   ;;  %p50_p0 = scmp.ne.s32.totalorder %s825_s20, %s821_s19 }
   0xc   : > { %p51_p1 = scmp.eq.s32.totalorder %s837_s23, 0  ;;  %p56_p2 = scmp.ne.s32.totalorder %s821_s19, %s817_s18 }
   0xd   : > { %p916_p3 = scmp.eq.s32.totalorder %s530_s24, 0  ;;  %p166_p4 = scmp.eq.s32.totalorder %s530_s24, 1 }
   0xe   : > { %p920_p5 = por %p51_p1, %p50_p0  ;;  %p172_p6 = scmp.eq.s32.totalorder %s531_s25, 1 }
   0xf   : > { %p926_p7 = por %p916_p3, %p56_p2  ;;  %p930_p8 = por %p166_p4, %p50_p0 }
  0x10   : > { %p934_p9 = por %p172_p6, %p56_p2  ;;  %p532_p10 = scmp.ge.s32.totalorder %s837_s23, 1 }
  0x11   : > { %p179_p11 = scmp.lt.s32.totalorder %s837_s23, 3  ;;  %s1060_s1 = sld [smem:[#allocation13_spill]] }
  0x12   : > { %s839_s11 = smov [#allocation5]   ;;  %p535_p13 = scmp.ge.s32.totalorder %s837_s23, 2 }
  0x13   : > { %p943_p12 = pnand %p532_p10, %p179_p11  ;;  %s193_s12 = sshll.u32 %s839_s11, 4  ;;  %s194_s12 = int_to_ptr.vmem [resolvable:$true] %s193_s12 }
  0x14   : > { %p591_p1 = scmp.lt.s32.totalorder %s837_s23, 2  ;;  %s1062_s3 = sld [smem:[#allocation14_spill]] }
  0x15   : > { %p574_p0 = pneg %p943_p12  ;;  %s840_s17 = smov [#allocation7]  }
  0x16   : > { %p958_p4 = pnand %p591_p1, %p920_p5  ;;  %s207_s24 = sshll.u32 %s840_s17, 4  ;;  %s208_s24 = int_to_ptr.vmem [resolvable:$true] %s207_s24 }
  0x17   : > { %s191_s9 = sshll.u32 %s1060_s1, 4  ;;  %p575_p2 = pnand %p574_p0, %p916_p3  ;;  %s192_s9 = int_to_ptr.hbm [resolvable:$true] %s191_s9 }
  0x18   : > { %s841_s25 = smov 64   ;;  %s842_s7 = smov 4  }
  0x19   : > { %577 = dma.hbm_to_vmem [thread:$0]  (!%p575_p2), %s192_s9, 16, %s194_s12, [#allocation6]  }
  0x1a   : > { %s205_s15 = sshll.u32 %s1062_s3, 4  ;;  %s224_s8 = sand.u32 1, %s825_s20   ;;  %s206_s15 = int_to_ptr.hbm [resolvable:$true] %s205_s15 }
  0x1b   : > { %580 = dma.hbm_to_vmem [thread:$0]  (!%p575_p2), %s206_s15, 256, %s208_s24, [#allocation6], %s841_s25, %s841_s25, %s842_s7  }
  0x1c   : > { %s34_s11 = sadd.s32 1, %s833_s22  ;;  %s536_s13 = sshll.u32 %s224_s8, 4 }
  0x1d   : > { %p36_p6 = scmp.ge.s32.totalorder %s34_s11, 2  ;;  %s558_s28 = sshll.u32 %s833_s22, 4 }
  0x1e   : > { %s228_s14 = scalar_lea.vmem [#allocation2], %s536_s13  ;;  %s235_s9 = scalar_lea.hbm %s1044_s0, %s558_s28 }
  0x1f   : > { %s238_s26 = sshll.u32 %s228_s14, 4  ;;  %s1072_s11 = smov (%p36_p6, %s34_s11), 0  ;;  %s239_s26 = int_to_ptr.vmem [resolvable:$true] %s238_s26 }
  0x20   : > { %s38_s12 = ssub.s32 %s833_s22, %s1072_s11  ;;  %s236_s3 = sshll.u32 %s235_s9, 4  ;;  %s237_s3 = int_to_ptr.hbm [resolvable:$true] %s236_s3 }
  0x21   : > { %p41_p5 = scmp.eq.s32.totalorder %s38_s12, 0  ;;  %s1064_s15 = sadd.s32 1, %s825_s20 }
  0x22   : > { %s225_s25 = scalar_lea.sflag [#allocation3], %s224_s8  ;;  %s843_s7 = smov 128  }
  0x23   : > { %s975_s24 = scalar_select %p41_p5, %s825_s20, %s1064_s15  }
  0x24   : > { %s844_s23 = smov 8   ;;  %250 = sbr.rel (%p943_p12) target bundleno = 465 (0x1d1), region = 40 }
  0x25   : > { %584 = dma.hbm_to_vmem [thread:$0]  (!%p958_p4), %s237_s3, 256, %s239_s26, %s225_s25, %s843_s7, %s843_s7, %s844_s23  }
  0x26   : > { %s982_s1 = sand.u32 (!%p943_p12), 1, %s821_s19  }
  0x27   : > { %s540_s13 = sshll.u32 (!%p943_p12), %s982_s1, 4  ;;  %s253_s28 = scalar_lea.sflag (!%p943_p12), [#allocation3], %s982_s1 }
  0x28   : > { %s256_s14 = scalar_lea.vmem (!%p943_p12), [#allocation2], %s540_s13 }
  0x29   : > { %804 = dma.done.wait (%p926_p7), %s253_s28, 256  }
  0x2a   : > { %806 = vsyncadd (%p926_p7), %s253_s28, 4294967040 }
  0x2b   : > { %808 = dma.done.wait (%p916_p3), [#allocation6], 272  }
  0x2c   : > { %810 = vsyncadd (%p916_p3), [#allocation6], 4294967024  ;;  %vm299_vm0 = vcmask 261120   ;;  %v297_v0 = vld [vmem:[%s256_s14] sm:$0xff]  ;;  %v298_v2 = vld [vmem:[%s256_s14 + $0x8] sm:$0xff]  ;;  %v845_v4 = vmov 32.0  }
  0x2d   : > { %v300_v1 = vsel %vm299_vm0, %v297_v0, 0.0  ;;  %v303_v3 = vsel %vm299_vm0, %v298_v2, 0.0  ;;  %655 = vrcp.f32 %v845_v4  ;;  %v560_v21 = vld [vmem:[#allocation7 + $0x8] sm:$0xff]  ;;  %v559_v23 = vld [vmem:[#allocation7] sm:$0xff]  ;;  %v652_v42 = vld [vmem:[#allocation5] ss:$0 sm:$0xff] }
  0x2e   : > { %301 = vadd.xlane.f32.xlu0 %v300_v1  ;;  %393 = vmatpush.bf16.msra.mxu0 %v560_v21  ;;  %v653_v47 = vld [vmem:[%s1046_s2] ss:$0 sm:$0xff]  ;;  %s543_s29 = sshll.u32 %s982_s1, 3  ;;  %s561_s10 = sshll.u32 %s829_s21, 3  ;;  %vm403_vm8 = vcmask 257024  }
  0x2f   : > { %v654_v52 = vld [vmem:[%s1048_s4] ss:$0 sm:$0xff]  ;;  %s420_s17 = scalar_lea.hbm %s1049_s5, %s561_s10  ;;  %s293_s9 = scalar_lea.vmem [#allocation8], %s543_s29 }
  0x30   : > { %s421_s12 = sshll.u32 %s293_s9, 4  ;;  %s423_s15 = sshll.u32 %s420_s17, 4  ;;  %s422_s12 = int_to_ptr.vmem [resolvable:$true] %s421_s12  ;;  %s424_s15 = int_to_ptr.hbm [resolvable:$true] %s423_s15 }
  0x31   : > { %s407_s25 = scalar_lea.sflag [#allocation4], %s982_s1  ;;  %s765_s7 = sshra.s32 %s424_s15, 4  ;;  %s766_s7 = int_to_ptr.hbm [resolvable:$true] %s765_s7 }
  0x32   : > { %394 = vmatpush.bf16.msra.mxu0 %v559_v23  ;;  %s767_s21 = scalar_lea.hbm %s766_s7, 8  ;;  %s771_s14 = scalar_lea.hbm %s1049_s5, 16 }
  0x33   : > { %v656_v5 = vpop.eup %655  ;;  %p768_p3 = scmp.ne.s32.totalorder %s766_s7, %s767_s21  ;;  %p772_p11 = scmp.lt.s32.totalorder %s766_s7, %s1049_s5 }
  0x34   : > { %v307_v6 = vmul.f32 32.0, %v656_v5  ;;  %vm311_vm1 = vweird.f32 %v656_v5  ;;  %p773_p12 = scmp.lt.s32.totalorder %s771_s14, %s767_s21 }
  0x35   : > { %p769_p7 = pnand %p768_p3, %p930_p8 }
  0x36   : > { %304 = vadd.xlane.f32.xlu0 %v303_v3  ;;  %v308_v7 = vsub.f32 1.0, %v307_v6  ;;  %p774_p0 = por %p773_p12, %p772_p11 }
  0x37   : > { %p770_p10 = pneg %p769_p7 }
  0x38   : > { %v309_v8 = vmul.f32 %v656_v5, %v308_v7 }
  0x39   : > { %p775_p1 = pnand %p774_p0, %p770_p10 }
  0x3a   : > { %v310_v9 = vadd.f32 %v656_v5, %v309_v8 }
  0x3c   : > { %v312_v10 = vsel %vm311_vm1, %v656_v5, %v310_v9 }
  0xa1   : > { %v302_v11 = vpop.xlane.xlu0 %301 }
  0xa2   : > { %v313_v12 = vmul.f32 %v312_v10, %v302_v11 }
  0xa4   : > { %v315_v13 = vsub.f32 %v297_v0, %v313_v12 }
  0xa6   : > { %v317_v14 = vmul.f32 %v315_v13, %v315_v13 }
  0xa8   : > { %v319_v15 = vsel %vm299_vm0, %v317_v14, 0.0 }
  0xa9   : > { %320 = vadd.xlane.f32.xlu1 %v319_v15  ;;  %v305_v16 = vpop.xlane.xlu0 %304 }
  0xaa   : > { %v314_v17 = vmul.f32 %v312_v10, %v305_v16 }
  0xac   : > { %v316_v18 = vsub.f32 %v298_v2, %v314_v17 }
  0xae   : > { %v318_v19 = vmul.f32 %v316_v18, %v316_v18 }
  0xb0   : > { %v322_v20 = vsel %vm299_vm0, %v318_v19, 0.0 }
  0xb1   : > { %323 = vadd.xlane.f32.xlu1 %v322_v20 }
 0x11c   : > { %v321_v22 = vpop.xlane.xlu1 %320 }
 0x11d   : > { %v325_v24 = vmul.f32 %v321_v22, %v312_v10 }
 0x11f   : > { %v327_v25 = vadd.f32 1e-05, %v325_v24 }
 0x121   : > { %657 = vrsqrt.f32 %v327_v25  ;;  %vm335_vm3 = vweird.f32 %v327_v25 }
 0x124   : > { %v324_v26 = vpop.xlane.xlu1 %323 }
 0x125   : > { %v326_v27 = vmul.f32 %v324_v26, %v312_v10 }
 0x127   : > { %v658_v28 = vpop.eup %657  ;;  %v328_v29 = vadd.f32 1e-05, %v326_v27 }
 0x128   : > { %v330_v30 = vmul.f32 %v658_v28, %v327_v25  ;;  %vm336_vm2 = vweird.f32 %v658_v28 }
 0x129   : > { %659 = vrsqrt.f32 %v328_v29  ;;  %vm337_vm4 = vmor %vm335_vm3, %vm336_vm2  ;;  %vm345_vm6 = vweird.f32 %v328_v29 }
 0x12a   : > { %v331_v31 = vmul.f32 %v658_v28, %v330_v30 }
 0x12c   : > { %v332_v32 = vmul.f32 0.5, %v331_v31 }
 0x12e   : > { %v333_v33 = vsub.f32 1.5, %v332_v32 }
 0x12f   : > { %v660_v34 = vpop.eup %659 }
 0x130   : > { %v334_v35 = vmul.f32 %v658_v28, %v333_v33  ;;  %v340_v36 = vmul.f32 %v660_v34, %v328_v29  ;;  %vm346_vm5 = vweird.f32 %v660_v34 }
 0x131   : > { %vm347_vm7 = vmor %vm345_vm6, %vm346_vm5 }
 0x132   : > { %v341_v37 = vmul.f32 %v660_v34, %v340_v36  ;;  %v338_v38 = vsel %vm337_vm4, %v658_v28, %v334_v35 }
 0x133   : > { %v349_v41 = vmul.f32 %v338_v38, %v315_v13 }
 0x134   : > { %v342_v39 = vmul.f32 0.5, %v341_v37 }
 0x135   : > { %v355_v46 = vmul.f32 %v652_v42, %v349_v41 }
 0x136   : > { %v343_v40 = vsub.f32 1.5, %v342_v39 }
 0x137   : > { %v361_v49 = vadd.f32 %v653_v47, %v355_v46 }
 0x138   : > { %v344_v43 = vmul.f32 %v660_v34, %v343_v40 }
 0x13a   : > { %v348_v44 = vsel %vm347_vm7, %v660_v34, %v344_v43 }
 0x13b   : > { %v350_v45 = vmul.f32 %v348_v44, %v316_v18 }
 0x13d   : > { %v356_v48 = vmul.f32 %v652_v42, %v350_v45 }
 0x13f   : > { %v362_v50 = vadd.f32 %v653_v47, %v356_v48 }
 0x141   : > { %v363_v51 = vpack.c.bf16 %v362_v50, %v361_v49 }
 0x143   : > { %552 = vmatmul.msk.bf16.vlgmr.msra.gmra.mxu0 %vm299_vm0, %v363_v51 }
 0x1c0   : > { %v396_v53 = vpop.f32.mrf.mxu0 }
 0x1c1   : > { %v397_v54 = vadd.f32 %v654_v52, %v396_v53 }
 0x1c3   : > { %v401_v55 = vpack.c.bf16 %v397_v54, %v397_v54 }
 0x1c5   : > { %404 = vst.msk [vmem:[%s293_s9] sm:$0xf] %vm403_vm8, %v401_v55 }
 0x1c8   : > { %v398_v56 = vpop.f32.mrf.mxu0 }
 0x1c9   : > { %v399_v57 = vadd.f32 %v654_v52, %v398_v56 }
 0x1cb   : > { %v402_v58 = vpack.c.bf16 %v399_v57, %v399_v57 }
 0x1cd   : > { %405 = vst.msk [vmem:[%s293_s9 + $0x4] sm:$0xf] %vm403_vm8, %v402_v58 }
 0x1ce   : > { %778 = shalt.err (!%p775_p1)
}
 0x1cf   : > { %s846_s1 = smov 64   ;;  %s847_s26 = smov 4  }
 0x1d0   : > { %572 = dma.vmem_to_hbm [thread:$0]  (%p930_p8), %s422_s12, 128, %s424_s15, %s407_s25, %s846_s1, %s846_s1, %s847_s26  }
 0x1d1 PF: > { %s1065_s27 = sld [smem:[#allocation12_spill]]  ;;  %s438_s29 = sand.u32 1, %s817_s18  }
 0x1d2   : > { %p586_p2 = pnand %p535_p13, %p934_p9  ;;  %s439_s10 = scalar_lea.sflag [#allocation4], %s438_s29 }
 0x1d4   : > { %p587_p4 = pneg %p586_p2 }
 0x1d6   : > { %812 = dma.done.wait (%p587_p4), %s439_s10, 128  }
 0x1d7   : > { %814 = vsyncadd (%p587_p4), %s439_s10, 4294967168  ;;  %s22_s23 = sadd.s32 1, %s1065_s27   ;;  %s1066_s18 = smov %s821_s19 }
 0x1d8   : > { %p19_p6 = scmp.ge.s32.totalorder %s22_s23, 4   ;;  %s1067_s19 = smov %s825_s20 }
 0x1d9   : > { %s1068_s20 = smov %s975_s24  ;;  %s1069_s21 = smov %s833_s22 }
 0x1da   : > { %s1070_s22 = smov %s1072_s11  ;;  %21 = sbr.rel (!%p19_p6) target bundleno = 10 (0xa), region = 93 }
 0x1df   :  { %445 = vsyncpa [#allocation3], 1 }
 0x1e0   :  { %447 = vsyncpa [#allocation3 + $0x1], 1 }
 0x1e1   :  { %448 = vsyncpa [#allocation6], 1 }
 0x1e2   :  { %449 = vsyncpa [#allocation4], 1 }
 0x1e3   :  { %451 = vsyncpa [#allocation4 + $0x1], 1 }

// kernel: tpu_custom_call.1
= control target key start
LH: loop header
LB: loop body
LE: loop exit
PB: predicated region body
PF: predicated region fallthrough
CT: control target
= control target key end

     0   :  { %s1044_s0 = inlined_call_operand.hbm [shape: f32[2,16,32], index: 0, kind: input, shape index: {}]   ;;  %s1045_s1 = inlined_call_operand.hbm [shape: f32[1,32], index: 1, kind: input, shape index: {}]   ;;  %s1046_s2 = inlined_call_operand.vmem [shape: f32[1,32], index: 2, kind: input, shape index: {}]   ;;  %s1047_s3 = inlined_call_operand.hbm [shape: bf16[32,32], index: 3, kind: input, shape index: {}]   ;;  %s1048_s4 = inlined_call_operand.vmem [shape: f32[1,32], index: 4, kind: input, shape index: {}]   ;;  %s1049_s5 = inlined_call_operand.hbm [shape: bf16[2,16,32], index: 5, kind: output, shape index: {}]  }
   0x1   :  { %1052 = sst [smem:[#allocation13_spill]] %s1045_s1 }
   0x2   :  { %1053 = sst [smem:[#allocation14_spill]] %s1047_s3 }
   0x3   :  { %10 = vsyncpa [#allocation3], 0 }
   0x4   :  { %12 = vsyncpa [#allocation3 + $0x1], 0 }
   0x5   :  { %13 = vsyncpa [#allocation6], 0 }
   0x6   :  { %14 = vsyncpa [#allocation4], 0 }
   0x7   :  { %16 = vsyncpa [#allocation4 + $0x1], 0  ;;  %s878_s18 = smov 0   ;;  %s880_s19 = smov 0  }
   0x8   :  { %s882_s20 = smov 0   ;;  %s884_s21 = smov 0  }
   0x9   :  { %s886_s22 = smov 0   ;;  %s888_s23 = smov 0  }
   0xa LB: > { %1054 = sst [smem:[#allocation12_spill]] %s837_s23  ;;  %s530_s24 = sadd.s32 4294967295, %s837_s23   ;;  %s837_s23 = sphi %s888_s23, %s22_s23   ;;  %s833_s22 = sphi %s886_s22, %s1070_s22   ;;  %s829_s21 = sphi %s884_s21, %s1069_s21   ;;  %s825_s20 = sphi %s882_s20, %s1068_s20   ;;  %s821_s19 = sphi %s880_s19, %s1067_s19   ;;  %s817_s18 = sphi %s878_s18, %s1066_s18  }
   0xb   : > { %s531_s25 = sadd.s32 4294967294, %s837_s23   ;;  %p50_p0 = scmp.ne.s32.totalorder %s825_s20, %s821_s19 }
   0xc   : > { %p51_p1 = scmp.eq.s32.totalorder %s837_s23, 0  ;;  %p56_p2 = scmp.ne.s32.totalorder %s821_s19, %s817_s18 }
   0xd   : > { %p916_p3 = scmp.eq.s32.totalorder %s530_s24, 0  ;;  %p166_p4 = scmp.eq.s32.totalorder %s530_s24, 1 }
   0xe   : > { %p920_p5 = por %p51_p1, %p50_p0  ;;  %p172_p6 = scmp.eq.s32.totalorder %s531_s25, 1 }
   0xf   : > { %p926_p7 = por %p916_p3, %p56_p2  ;;  %p930_p8 = por %p166_p4, %p50_p0 }
  0x10   : > { %p934_p9 = por %p172_p6, %p56_p2  ;;  %p532_p10 = scmp.ge.s32.totalorder %s837_s23, 1 }
  0x11   : > { %p179_p11 = scmp.lt.s32.totalorder %s837_s23, 3  ;;  %s1060_s1 = sld [smem:[#allocation13_spill]] }
  0x12   : > { %s839_s11 = smov [#allocation5]   ;;  %p535_p13 = scmp.ge.s32.totalorder %s837_s23, 2 }
  0x13   : > { %p943_p12 = pnand %p532_p10, %p179_p11  ;;  %s193_s12 = sshll.u32 %s839_s11, 4  ;;  %s194_s12 = int_to_ptr.vmem [resolvable:$true] %s193_s12 }
  0x14   : > { %p591_p1 = scmp.lt.s32.totalorder %s837_s23, 2  ;;  %s1062_s3 = sld [smem:[#allocation14_spill]] }
  0x15   : > { %p574_p0 = pneg %p943_p12  ;;  %s840_s17 = smov [#allocation7]  }
  0x16   : > { %p958_p4 = pnand %p591_p1, %p920_p5  ;;  %s207_s24 = sshll.u32 %s840_s17, 4  ;;  %s208_s24 = int_to_ptr.vmem [resolvable:$true] %s207_s24 }
  0x17   : > { %s191_s9 = sshll.u32 %s1060_s1, 4  ;;  %p575_p2 = pnand %p574_p0, %p916_p3  ;;  %s192_s9 = int_to_ptr.hbm [resolvable:$true] %s191_s9 }
  0x18   : > { %s841_s25 = smov 64   ;;  %s842_s7 = smov 4  }
  0x19   : > { %577 = dma.hbm_to_vmem [thread:$0]  (!%p575_p2), %s192_s9, 16, %s194_s12, [#allocation6]  }
  0x1a   : > { %s205_s15 = sshll.u32 %s1062_s3, 4  ;;  %s224_s8 = sand.u32 1, %s825_s20   ;;  %s206_s15 = int_to_ptr.hbm [resolvable:$true] %s205_s15 }
  0x1b   : > { %580 = dma.hbm_to_vmem [thread:$0]  (!%p575_p2), %s206_s15, 256, %s208_s24, [#allocation6], %s841_s25, %s841_s25, %s842_s7  }
  0x1c   : > { %s34_s11 = sadd.s32 1, %s833_s22  ;;  %s536_s13 = sshll.u32 %s224_s8, 4 }
  0x1d   : > { %p36_p6 = scmp.ge.s32.totalorder %s34_s11, 2  ;;  %s558_s28 = sshll.u32 %s833_s22, 4 }
  0x1e   : > { %s228_s14 = scalar_lea.vmem [#allocation2], %s536_s13  ;;  %s235_s9 = scalar_lea.hbm %s1044_s0, %s558_s28 }
  0x1f   : > { %s238_s26 = sshll.u32 %s228_s14, 4  ;;  %s1072_s11 = smov (%p36_p6, %s34_s11), 0  ;;  %s239_s26 = int_to_ptr.vmem [resolvable:$true] %s238_s26 }
  0x20   : > { %s38_s12 = ssub.s32 %s833_s22, %s1072_s11  ;;  %s236_s3 = sshll.u32 %s235_s9, 4  ;;  %s237_s3 = int_to_ptr.hbm [resolvable:$true] %s236_s3 }
  0x21   : > { %p41_p5 = scmp.eq.s32.totalorder %s38_s12, 0  ;;  %s1064_s15 = sadd.s32 1, %s825_s20 }
  0x22   : > { %s225_s25 = scalar_lea.sflag [#allocation3], %s224_s8  ;;  %s843_s7 = smov 128  }
  0x23   : > { %s975_s24 = scalar_select %p41_p5, %s825_s20, %s1064_s15  }
  0x24   : > { %s844_s23 = smov 8   ;;  %250 = sbr.rel (%p943_p12) target bundleno = 465 (0x1d1), region = 40 }
  0x25   : > { %584 = dma.hbm_to_vmem [thread:$0]  (!%p958_p4), %s237_s3, 256, %s239_s26, %s225_s25, %s843_s7, %s843_s7, %s844_s23  }
  0x26   : > { %s982_s1 = sand.u32 (!%p943_p12), 1, %s821_s19  }
  0x27   : > { %s540_s13 = sshll.u32 (!%p943_p12), %s982_s1, 4  ;;  %s253_s28 = scalar_lea.sflag (!%p943_p12), [#allocation3], %s982_s1 }
  0x28   : > { %s256_s14 = scalar_lea.vmem (!%p943_p12), [#allocation2], %s540_s13 }
  0x29   : > { %804 = dma.done.wait (%p926_p7), %s253_s28, 256  }
  0x2a   : > { %806 = vsyncadd (%p926_p7), %s253_s28, 4294967040 }
  0x2b   : > { %808 = dma.done.wait (%p916_p3), [#allocation6], 272  }
  0x2c   : > { %810 = vsyncadd (%p916_p3), [#allocation6], 4294967024  ;;  %vm299_vm0 = vcmask 261120   ;;  %v297_v0 = vld [vmem:[%s256_s14] sm:$0xff]  ;;  %v298_v2 = vld [vmem:[%s256_s14 + $0x8] sm:$0xff]  ;;  %v845_v4 = vmov 32.0  }
  0x2d   : > { %v300_v1 = vsel %vm299_vm0, %v297_v0, 0.0  ;;  %v303_v3 = vsel %vm299_vm0, %v298_v2, 0.0  ;;  %655 = vrcp.f32 %v845_v4  ;;  %v560_v21 = vld [vmem:[#allocation7 + $0x8] sm:$0xff]  ;;  %v559_v23 = vld [vmem:[#allocation7] sm:$0xff]  ;;  %v652_v42 = vld [vmem:[#allocation5] ss:$0 sm:$0xff] }
  0x2e   : > { %301 = vadd.xlane.f32.xlu0 %v300_v1  ;;  %393 = vmatpush.bf16.msra.mxu0 %v560_v21  ;;  %v653_v47 = vld [vmem:[%s1046_s2] ss:$0 sm:$0xff]  ;;  %s543_s29 = sshll.u32 %s982_s1, 3  ;;  %s561_s10 = sshll.u32 %s829_s21, 3  ;;  %vm403_vm8 = vcmask 257024  }
  0x2f   : > { %v654_v52 = vld [vmem:[%s1048_s4] ss:$0 sm:$0xff]  ;;  %s420_s17 = scalar_lea.hbm %s1049_s5, %s561_s10  ;;  %s293_s9 = scalar_lea.vmem [#allocation8], %s543_s29 }
  0x30   : > { %s421_s12 = sshll.u32 %s293_s9, 4  ;;  %s423_s15 = sshll.u32 %s420_s17, 4  ;;  %s422_s12 = int_to_ptr.vmem [resolvable:$true] %s421_s12  ;;  %s424_s15 = int_to_ptr.hbm [resolvable:$true] %s423_s15 }
  0x31   : > { %s407_s25 = scalar_lea.sflag [#allocation4], %s982_s1  ;;  %s765_s7 = sshra.s32 %s424_s15, 4  ;;  %s766_s7 = int_to_ptr.hbm [resolvable:$true] %s765_s7 }
  0x32   : > { %394 = vmatpush.bf16.msra.mxu0 %v559_v23  ;;  %s767_s21 = scalar_lea.hbm %s766_s7, 8  ;;  %s771_s14 = scalar_lea.hbm %s1049_s5, 16 }
  0x33   : > { %v656_v5 = vpop.eup %655  ;;  %p768_p3 = scmp.ne.s32.totalorder %s766_s7, %s767_s21  ;;  %p772_p11 = scmp.lt.s32.totalorder %s766_s7, %s1049_s5 }
  0x34   : > { %v307_v6 = vmul.f32 32.0, %v656_v5  ;;  %vm311_vm1 = vweird.f32 %v656_v5  ;;  %p773_p12 = scmp.lt.s32.totalorder %s771_s14, %s767_s21 }
  0x35   : > { %p769_p7 = pnand %p768_p3, %p930_p8 }
  0x36   : > { %304 = vadd.xlane.f32.xlu0 %v303_v3  ;;  %v308_v7 = vsub.f32 1.0, %v307_v6  ;;  %p774_p0 = por %p773_p12, %p772_p11 }
  0x37   : > { %p770_p10 = pneg %p769_p7 }
  0x38   : > { %v309_v8 = vmul.f32 %v656_v5, %v308_v7 }
  0x39   : > { %p775_p1 = pnand %p774_p0, %p770_p10 }
  0x3a   : > { %v310_v9 = vadd.f32 %v656_v5, %v309_v8 }
  0x3c   : > { %v312_v10 = vsel %vm311_vm1, %v656_v5, %v310_v9 }
  0xa1   : > { %v302_v11 = vpop.xlane.xlu0 %301 }
  0xa2   : > { %v313_v12 = vmul.f32 %v312_v10, %v302_v11 }
  0xa4   : > { %v315_v13 = vsub.f32 %v297_v0, %v313_v12 }
  0xa6   : > { %v317_v14 = vmul.f32 %v315_v13, %v315_v13 }
  0xa8   : > { %v319_v15 = vsel %vm299_vm0, %v317_v14, 0.0 }
  0xa9   : > { %320 = vadd.xlane.f32.xlu1 %v319_v15  ;;  %v305_v16 = vpop.xlane.xlu0 %304 }
  0xaa   : > { %v314_v17 = vmul.f32 %v312_v10, %v305_v16 }
  0xac   : > { %v316_v18 = vsub.f32 %v298_v2, %v314_v17 }
  0xae   : > { %v318_v19 = vmul.f32 %v316_v18, %v316_v18 }
  0xb0   : > { %v322_v20 = vsel %vm299_vm0, %v318_v19, 0.0 }
  0xb1   : > { %323 = vadd.xlane.f32.xlu1 %v322_v20 }
 0x11c   : > { %v321_v22 = vpop.xlane.xlu1 %320 }
 0x11d   : > { %v325_v24 = vmul.f32 %v321_v22, %v312_v10 }
 0x11f   : > { %v327_v25 = vadd.f32 1e-05, %v325_v24 }
 0x121   : > { %657 = vrsqrt.f32 %v327_v25  ;;  %vm335_vm3 = vweird.f32 %v327_v25 }
 0x124   : > { %v324_v26 = vpop.xlane.xlu1 %323 }
 0x125   : > { %v326_v27 = vmul.f32 %v324_v26, %v312_v10 }
 0x127   : > { %v658_v28 = vpop.eup %657  ;;  %v328_v29 = vadd.f32 1e-05, %v326_v27 }
 0x128   : > { %v330_v30 = vmul.f32 %v658_v28, %v327_v25  ;;  %vm336_vm2 = vweird.f32 %v658_v28 }
 0x129   : > { %659 = vrsqrt.f32 %v328_v29  ;;  %vm337_vm4 = vmor %vm335_vm3, %vm336_vm2  ;;  %vm345_vm6 = vweird.f32 %v328_v29 }
 0x12a   : > { %v331_v31 = vmul.f32 %v658_v28, %v330_v30 }
 0x12c   : > { %v332_v32 = vmul.f32 0.5, %v331_v31 }
 0x12e   : > { %v333_v33 = vsub.f32 1.5, %v332_v32 }
 0x12f   : > { %v660_v34 = vpop.eup %659 }
 0x130   : > { %v334_v35 = vmul.f32 %v658_v28, %v333_v33  ;;  %v340_v36 = vmul.f32 %v660_v34, %v328_v29  ;;  %vm346_vm5 = vweird.f32 %v660_v34 }
 0x131   : > { %vm347_vm7 = vmor %vm345_vm6, %vm346_vm5 }
 0x132   : > { %v341_v37 = vmul.f32 %v660_v34, %v340_v36  ;;  %v338_v38 = vsel %vm337_vm4, %v658_v28, %v334_v35 }
 0x133   : > { %v349_v41 = vmul.f32 %v338_v38, %v315_v13 }
 0x134   : > { %v342_v39 = vmul.f32 0.5, %v341_v37 }
 0x135   : > { %v355_v46 = vmul.f32 %v652_v42, %v349_v41 }
 0x136   : > { %v343_v40 = vsub.f32 1.5, %v342_v39 }
 0x137   : > { %v361_v49 = vadd.f32 %v653_v47, %v355_v46 }
 0x138   : > { %v344_v43 = vmul.f32 %v660_v34, %v343_v40 }
 0x13a   : > { %v348_v44 = vsel %vm347_vm7, %v660_v34, %v344_v43 }
 0x13b   : > { %v350_v45 = vmul.f32 %v348_v44, %v316_v18 }
 0x13d   : > { %v356_v48 = vmul.f32 %v652_v42, %v350_v45 }
 0x13f   : > { %v362_v50 = vadd.f32 %v653_v47, %v356_v48 }
 0x141   : > { %v363_v51 = vpack.c.bf16 %v362_v50, %v361_v49 }
 0x143   : > { %552 = vmatmul.msk.bf16.vlgmr.msra.gmra.mxu0 %vm299_vm0, %v363_v51 }
 0x1c0   : > { %v396_v53 = vpop.f32.mrf.mxu0 }
 0x1c1   : > { %v397_v54 = vadd.f32 %v654_v52, %v396_v53 }
 0x1c3   : > { %v401_v55 = vpack.c.bf16 %v397_v54, %v397_v54 }
 0x1c5   : > { %404 = vst.msk [vmem:[%s293_s9] sm:$0xf] %vm403_vm8, %v401_v55 }
 0x1c8   : > { %v398_v56 = vpop.f32.mrf.mxu0 }
 0x1c9   : > { %v399_v57 = vadd.f32 %v654_v52, %v398_v56 }
 0x1cb   : > { %v402_v58 = vpack.c.bf16 %v399_v57, %v399_v57 }
 0x1cd   : > { %405 = vst.msk [vmem:[%s293_s9 + $0x4] sm:$0xf] %vm403_vm8, %v402_v58 }
 0x1ce   : > { %778 = shalt.err (!%p775_p1)
}
 0x1cf   : > { %s846_s1 = smov 64   ;;  %s847_s26 = smov 4  }
 0x1d0   : > { %572 = dma.vmem_to_hbm [thread:$0]  (%p930_p8), %s422_s12, 128, %s424_s15, %s407_s25, %s846_s1, %s846_s1, %s847_s26  }
 0x1d1 PF: > { %s1065_s27 = sld [smem:[#allocation12_spill]]  ;;  %s438_s29 = sand.u32 1, %s817_s18  }
 0x1d2   : > { %p586_p2 = pnand %p535_p13, %p934_p9  ;;  %s439_s10 = scalar_lea.sflag [#allocation4], %s438_s29 }
 0x1d4   : > { %p587_p4 = pneg %p586_p2 }
 0x1d6   : > { %812 = dma.done.wait (%p587_p4), %s439_s10, 128  }
 0x1d7   : > { %814 = vsyncadd (%p587_p4), %s439_s10, 4294967168  ;;  %s22_s23 = sadd.s32 1, %s1065_s27   ;;  %s1066_s18 = smov %s821_s19 }
 0x1d8   : > { %p19_p6 = scmp.ge.s32.totalorder %s22_s23, 4   ;;  %s1067_s19 = smov %s825_s20 }
 0x1d9   : > { %s1068_s20 = smov %s975_s24  ;;  %s1069_s21 = smov %s833_s22 }
 0x1da   : > { %s1070_s22 = smov %s1072_s11  ;;  %21 = sbr.rel (!%p19_p6) target bundleno = 10 (0xa), region = 93 }
 0x1df   :  { %445 = vsyncpa [#allocation3], 1 }
 0x1e0   :  { %447 = vsyncpa [#allocation3 + $0x1], 1 }
 0x1e1   :  { %448 = vsyncpa [#allocation6], 1 }
 0x1e2   :  { %449 = vsyncpa [#allocation4], 1 }
 0x1e3   :  { %451 = vsyncpa [#allocation4 + $0x1], 1 }

</bundles_post_ra>
